<compile_context>
chip_gen: v5e
topology: v5e:2x2
jax: 0.10.0
libtpu: 0.0.40
codegen_flags: <defaults>
</compile_context>

<pallas_src>
import functools

import jax
import jax.numpy as jnp
from jax.experimental import pallas as pl
from jax.experimental.pallas import tpu as pltpu

num_inputs = 784
num_outputs = 10

LANE = 128                    # pad output axis 10 -> 128 (one lane group, no further)
DEFAULT_BLOCK_B = 4096        # f32 x tile: 4096x784x4 ~= 12.25 MiB, x2 buffers ~= 24.5 MiB
SMALL_BATCH_FASTPATH = 1024   # below ~one tile of work, plain XLA gemv matches/beats Pallas


def linear_kernel(x_ref, wt_ref, b_ref, o_ref, *, compute_dtype):
    # x_ref : (TB, K) f32 -- cast to compute_dtype in-kernel (no separate XLA cast pass)
    # wt_ref: (K, N_PAD) compute_dtype, pre-transposed -> MXU-native RHS layout
    # b_ref : (1, N_PAD) f32; o_ref: (TB, N_PAD) f32, lane-dense unmasked stores
    x = x_ref[...].astype(compute_dtype)
    acc = jnp.dot(x, wt_ref[...], preferred_element_type=jnp.float32)
    o_ref[...] = (acc + b_ref[...]).astype(o_ref.dtype)


def _pick_batch_tile(batch, block_batch):
    # Balanced tiles: fewest tiles of size <= block_batch, spread evenly so padding
    # waste is < 1 tile; rounded up to the 8-row sublane multiple.
    n_tiles = max(1, pl.cdiv(batch, block_batch))
    if n_tiles == 1 and batch > 16:
        n_tiles = 2  # keep >= 2 grid steps so v7x's two TensorCores both get work
    return max(8, pl.cdiv(pl.cdiv(batch, n_tiles), 8) * 8)


def linear_net_forward(x, w, b, *, block_batch=DEFAULT_BLOCK_B,
                       compute_dtype=jnp.bfloat16,
                       small_batch_threshold=SMALL_BATCH_FASTPATH):
    """Forward of LinearNet: y = linear(x.view(B, -1)).

    x: (B, C, H, W) or (B, num_inputs) f32; w: (num_outputs, num_inputs); b: (num_outputs,).
    Returns (B, num_outputs) float32 (f32 accumulation in the MXU).
    NOTE: the Pallas path multiplies with bf16 operands (f32 accumulate); pass
    compute_dtype=jnp.float32 for f32-exact logits. The small-batch fast path is
    full f32 via plain XLA.
    """
    batch = x.shape[0]
    x_flat = x.reshape(batch, -1)            # glue: x.view(B, -1); NO dtype cast here
    k = x_flat.shape[1]
    n = w.shape[0]

    if batch < small_batch_threshold:
        # Launch/grid overhead dominates below ~one tile of work; XLA's fused gemv wins.
        return (x_flat.astype(jnp.float32) @ w.astype(jnp.float32).T
                + b.astype(jnp.float32))

    # Lane-dense output: zero-pad the output axis to a multiple of 128.
    n_pad = max(LANE, pl.cdiv(n, LANE) * LANE)
    # One-time weight transpose + pad in the wrapper (~200 KiB), resident in the kernel.
    w_t = jnp.zeros((k, n_pad), compute_dtype).at[:, :n].set(w.T.astype(compute_dtype))
    b_pad = jnp.zeros((1, n_pad), jnp.float32).at[0, :n].set(b.astype(jnp.float32))

    tb = _pick_batch_tile(batch, block_batch)
    grid = (pl.cdiv(batch, tb),)   # no input padding: ragged final block is bounded by Pallas

    bytes_accessed = (
        x_flat.size * x_flat.dtype.itemsize
        + w_t.size * w_t.dtype.itemsize
        + b_pad.size * b_pad.dtype.itemsize
        + batch * n_pad * 4
    )
    cost = pl.CostEstimate(
        flops=2 * batch * k * n_pad,
        transcendentals=0,
        bytes_accessed=bytes_accessed,
    )

    y_pad = pl.pallas_call(
        functools.partial(linear_kernel, compute_dtype=compute_dtype),
        out_shape=jax.ShapeDtypeStruct((batch, n_pad), jnp.float32),
        grid_spec=pltpu.PrefetchScalarGridSpec(
            num_scalar_prefetch=0,
            grid=grid,
            in_specs=[
                pl.BlockSpec((tb, k), lambda i: (i, 0)),      # x tiles stream over batch
                pl.BlockSpec((k, n_pad), lambda i: (0, 0)),   # transposed weight stays resident
                pl.BlockSpec((1, n_pad), lambda i: (0, 0)),   # bias stays resident
            ],
            out_specs=pl.BlockSpec((tb, n_pad), lambda i: (i, 0)),
        ),
        compiler_params=pltpu.CompilerParams(
            dimension_semantics=("parallel",),   # megacore / 2-TC sharding over batch
            vmem_limit_bytes=48 << 20,           # fits tb=4096 f32 x tiles under v7x 64 MiB
        ),
        cost_estimate=cost,
    )(x_flat, w_t, b_pad)

    # Only the column crop remains (rows are exact); padded cols >= n are exact zeros
    # because both w_t and b_pad are zero-filled there.
    return y_pad[:, :n]


if __name__ == "__main__":
    key = jax.random.PRNGKey(0)
    kx, kw, kb = jax.random.split(key, 3)

    # MNIST-like input. batch=50 is deliberately NOT a multiple of the batch tile so
    # the ragged-final-block path (no jnp.pad, bounded writeback) is exercised.
    batch = 50
    x = jax.random.normal(kx, (batch, 1, 28, 28), dtype=jnp.float32)

    # Deterministic params mimicking nn.Linear default init (uniform +-1/sqrt(fan_in)).
    bound = 1.0 / jnp.sqrt(jnp.float32(num_inputs))
    w = jax.random.uniform(kw, (num_outputs, num_inputs), jnp.float32, -bound, bound)
    b = jax.random.uniform(kb, (num_outputs,), jnp.float32, -bound, bound)

    # Force the Pallas path (the default small-batch fast path would bypass it here).
    y = linear_net_forward(x, w, b, small_batch_threshold=0)
    jax.block_until_ready(y)

    # Reference using the same bf16 operand cast with f32 accumulation.
    x_bf = x.reshape(batch, -1).astype(jnp.bfloat16).astype(jnp.float32)
    w_bf = w.astype(jnp.bfloat16).astype(jnp.float32)
    y_ref = x_bf @ w_bf.T + b

    assert y.shape == (batch, num_outputs)
    assert y.dtype == jnp.float32
    assert jnp.allclose(y, y_ref, atol=2e-2, rtol=2e-2)

    # Sanity-check the default small-batch fast path (plain XLA, full f32).
    y_fast = linear_net_forward(x, w, b)
    jax.block_until_ready(y_fast)
    y_ref_f32 = x.reshape(batch, -1) @ w.T + b
    assert jnp.allclose(y_fast, y_ref_f32, atol=1e-4, rtol=1e-4)

    print("KERNEL_OK")
</pallas_src>

<mosaic_0001>
module attributes {stable_mosaic.version = 11 : i64} {
  func.func @linear_kernel(%arg0: i32, %arg1: memref<32x784xf32, #tpu.memory_space<vmem>>, %arg2: memref<784x128xbf16, #tpu.memory_space<vmem>>, %arg3: memref<1x128xf32, #tpu.memory_space<vmem>>, %arg4: memref<32x128xf32, #tpu.memory_space<vmem>>) attributes {dimension_semantics = [#tpu.dimension_semantics<parallel>], iteration_bounds = array<i64: 2>, scalar_prefetch = 0 : i64, scratch_operands = 0 : i64, tpu.core_type = #tpu.core_type<tc>, window_params = [{transform_indices = @transform_0, window_bounds = array<i64: 32, 784>}, {pipeline_mode = #tpu.pipeline_mode<synchronous>, transform_indices = @transform_1, window_bounds = array<i64: 784, 128>}, {pipeline_mode = #tpu.pipeline_mode<synchronous>, transform_indices = @transform_2, window_bounds = array<i64: 1, 128>}, {transform_indices = @transform_3, window_bounds = array<i64: 32, 128>}]} {
    %c0 = arith.constant 0 : index
    %c0_0 = arith.constant 0 : index
    %0 = vector.load %arg1[%c0, %c0_0] : memref<32x784xf32, #tpu.memory_space<vmem>>, vector<32x784xf32>
    %1 = arith.truncf %0 : vector<32x784xf32> to vector<32x784xbf16>
    %c0_1 = arith.constant 0 : index
    %c0_2 = arith.constant 0 : index
    %2 = vector.load %arg2[%c0_1, %c0_2] : memref<784x128xbf16, #tpu.memory_space<vmem>>, vector<784x128xbf16>
    %cst = arith.constant dense<0.000000e+00> : vector<32x128xf32>
    %3 = tpu.matmul %1, %2, %cst {dimension_numbers = #tpu.dot_dimension_numbers<[1], [0], [0], [1], [0, 0, 1, 1], [], []>} : vector<32x784xbf16>, vector<784x128xbf16>, vector<32x128xf32> -> vector<32x128xf32>
    %c0_3 = arith.constant 0 : index
    %c0_4 = arith.constant 0 : index
    %4 = vector.load %arg3[%c0_3, %c0_4] : memref<1x128xf32, #tpu.memory_space<vmem>>, vector<1x128xf32>
    %5 = vector.broadcast %4 : vector<1x128xf32> to vector<32x128xf32>
    %6 = arith.addf %3, %5 : vector<32x128xf32>
    %c0_5 = arith.constant 0 : index
    %c0_6 = arith.constant 0 : index
    %7 = vector.load %arg4[%c0_5, %c0_6] : memref<32x128xf32, #tpu.memory_space<vmem>>, vector<32x128xf32>
    tpu.vector_store %arg4[%c0_5, %c0_6], %6 {strides = array<i32>} : memref<32x128xf32, #tpu.memory_space<vmem>>, vector<32x128xf32>,
    return
  }
  func.func @transform_0(%arg0: i32) -> (i32, i32) {
    %c0_i32 = arith.constant 0 : i32
    %c0_i32_0 = arith.constant 0 : i32
    return %arg0, %c0_i32 : i32, i32
  }
  func.func @transform_1(%arg0: i32) -> (i32, i32) {
    %c0_i32 = arith.constant 0 : i32
    %c0_i32_0 = arith.constant 0 : i32
    %c0_i32_1 = arith.constant 0 : i32
    return %c0_i32, %c0_i32_0 : i32, i32
  }
  func.func @transform_2(%arg0: i32) -> (i32, i32) {
    %c0_i32 = arith.constant 0 : i32
    %c0_i32_0 = arith.constant 0 : i32
    %c0_i32_1 = arith.constant 0 : i32
    return %c0_i32, %c0_i32_0 : i32, i32
  }
  func.func @transform_3(%arg0: i32) -> (i32, i32) {
    %c0_i32 = arith.constant 0 : i32
    %c0_i32_0 = arith.constant 0 : i32
    return %arg0, %c0_i32 : i32, i32
  }
}

</mosaic_0001>

<bundles_post_ra>
// kernel: tpu_custom_call.1
= control target key start
LH: loop header
LB: loop body
LE: loop exit
PB: predicated region body
PF: predicated region fallthrough
CT: control target
= control target key end

     0   :  { %8 = vsyncpa [#allocation3], 0  ;;  %s1673_s0 = inlined_call_operand.hbm [shape: f32[50,784], index: 0, kind: input, shape index: {}]   ;;  %s1674_s1 = inlined_call_operand.hbm [shape: bf16[784,128], index: 1, kind: input, shape index: {}]   ;;  %s1675_s2 = inlined_call_operand.vmem [shape: f32[1,128], index: 2, kind: input, shape index: {}]   ;;  %s1676_s3 = inlined_call_operand.hbm [shape: f32[50,128], index: 3, kind: output, shape index: {}]  }
   0x1   :  { %10 = vsyncpa [#allocation3 + $0x1], 0 }
   0x2   :  { %11 = vsyncpa [#allocation6], 0 }
   0x3   :  { %12 = vsyncpa [#allocation4], 0 }
   0x4   :  { %14 = vsyncpa [#allocation4 + $0x1], 0  ;;  %s1437_s12 = smov 0   ;;  %s1439_s13 = smov 0  }
   0x5   :  { %s1441_s14 = smov 0   ;;  %s1443_s15 = smov 0  }
   0x6 LB: > { %s1458_s16 = sadd.s32 4294967295, %s1406_s15   ;;  %s917_s17 = sadd.s32 4294967294, %s1406_s15   ;;  %s1406_s15 = sphi %s1443_s15, %s1693_s15   ;;  %s1402_s14 = sphi %s1441_s14, %s1692_s14   ;;  %s1398_s13 = sphi %s1439_s13, %s1691_s13   ;;  %s1394_s12 = sphi %s1437_s12, %s1690_s12  }
   0x7   : > { %s1462_s18 = sadd.s32 1, %s1406_s15   ;;  %s27_s19 = sadd.s32 1, %s1402_s14 }
   0x8   : > { %s24_s20 = ssub.s32 %s1406_s15, %s1462_s18  ;;  %p34_p0 = scmp.ne.s32.totalorder %s1402_s14, %s1398_s13 }
   0x9   : > { %p25_p1 = scmp.eq.s32.totalorder %s24_s20, 0  ;;  %p35_p2 = scmp.eq.s32.totalorder %s1406_s15, 0 }
   0xa   : > { %p40_p3 = scmp.ne.s32.totalorder %s1398_s13, %s1394_s12  ;;  %p1678_p4 = scmp.eq.s32.totalorder %s1458_s16, 0 }
   0xb   : > { %s1474_s21 = scalar_select %p25_p1, %s1402_s14, %s27_s19  }
   0xc   : > { %p1476_p5 = por %p35_p2, %p34_p0  ;;  %p1482_p6 = por %p1678_p4, %p40_p3 }
   0xd   : > { %p106_p7 = scmp.eq.s32.totalorder %s1458_s16, 1  ;;  %p112_p8 = scmp.eq.s32.totalorder %s917_s17, 1 }
   0xe   : > { %p918_p9 = scmp.ge.s32.totalorder %s1406_s15, 1  ;;  %p119_p10 = scmp.lt.s32.totalorder %s1406_s15, 3 }
   0xf   : > { %p1489_p11 = por %p106_p7, %p34_p0  ;;  %p1493_p12 = por %p112_p8, %p40_p3 }
  0x10   : > { %p1497_p13 = pnand %p918_p9, %p119_p10  ;;  %s130_s29 = sshll.u32 %s1674_s1, 4  ;;  %s131_s29 = int_to_ptr.hbm [resolvable:$true] %s130_s29 }
  0x11   : > { %s1682_s25 = scalar_select %p1493_p12, 1, 0 }
  0x12   : > { %p1205_p1 = pneg %p1497_p13  ;;  %s1408_s30 = smov [#allocation5]  }
  0x13   : > { %s132_s4 = sshll.u32 %s1408_s30, 4  ;;  %s1409_s5 = smov 64   ;;  %s133_s4 = int_to_ptr.vmem [resolvable:$true] %s132_s4 }
  0x14   : > { %p1206_p0 = pnand %p1205_p1, %p1678_p4  ;;  %s1410_s6 = smov 4  }
  0x15   : > { %p1677_p2 = scmp.ge.s32.totalorder %s1406_s15, 2 }
  0x16   : > { %1208 = dma.hbm_to_vmem [thread:$0]  (!%p1206_p0), %s131_s29, 6272, %s133_s4, [#allocation6], %s1409_s5, %s1409_s5, %s1410_s6  }
  0x17   : > { %145 = sbr.rel (%p1677_p2) target bundleno = 69 (0x45), region = 24 }
  0x1c   : > { %148 = sbr.rel (!%p1476_p5) target bundleno = 69 (0x45), region = 28  ;;  %s149_s7 = sand.u32 (%p1476_p5), 1, %s1402_s14  }
  0x1d   : > { %s921_s8 = sshll.u32 (%p1476_p5), %s1406_s15, 2  ;;  %s1196_s9 = smul.u32 (%p1476_p5), 224, %s149_s7 }
  0x1e   : > { %s155_s10 = ssub.s32 (%p1476_p5), 7, %s921_s8  ;;  %s1515_s20 = scalar_lea.sflag (%p1476_p5), [#allocation3], %s149_s7 }
  0x1f   : > { %p156_p3 = scmp.lt.s32.totalorder (%p1476_p5), %s155_s10, 4  ;;  %s153_s27 = scalar_lea.vmem (%p1476_p5), [#allocation2], %s1196_s9 }
  0x21   : > { %s1695_s10 = smov (!%p156_p3, %s155_s10), 4 }
  0x22   : > { %s923_s11 = smul.u32 56, %s1695_s10 }
  0x24   : > { %s160_s17 = ssub.s32 224, %s923_s11 }
  0x25   : > { %s161_s19 = sshll.u32 %s160_s17, 4 }
  0x26   : > { %162 = vsyncadd %s1515_s20, %s161_s19  ;;  %p1518_p7 = scmp.ne.s32.totalorder %s923_s11, 0  ;;  %s1197_s28 = smul.u32 224, %s1406_s15 }
  0x27   : > { %s1523_s29 = sshll.u32 %s153_s27, 4  ;;  %s1525_s30 = smul.u32 896, %s1695_s10  ;;  %s171_s29 = int_to_ptr.vmem [resolvable:$true] %s1523_s29 }
  0x28   : > { %s166_s6 = scalar_lea.hbm %s1673_s0, %s1197_s28  ;;  %s1297_s28 = scalar_lea.hbm %s1673_s0, 392 }
  0x29   : > { %s168_s7 = sshll.u32 %s166_s6, 4  ;;  %s1288_s9 = sshrl.u32 %s1525_s30, 4  ;;  %s1531_s7 = int_to_ptr.hbm [resolvable:$true] %s168_s7 }
  0x2a   : > { %s1286_s8 = sshra.s32 %s1531_s7, 4  ;;  %s1324_s11 = sshll.u32 %s1288_s9, 4  ;;  %s1287_s8 = int_to_ptr.hbm [resolvable:$true] %s1286_s8 }
  0x2b   : > { %p1290_p5 = scmp.ne.s32.totalorder %s1324_s11, %s1525_s30  ;;  %s1291_s17 = sadd.s32 1, %s1288_s9 }
  0x2c   : > { %p1298_p1 = scmp.lt.s32.totalorder %s1287_s8, %s1673_s0 }
  0x2d   : > { %s1697_s17 = smov (!%p1290_p5, %s1291_s17), %s1288_s9 }
  0x2e   : > { %s1293_s10 = scalar_lea.hbm %s1287_s8, %s1697_s17 }
  0x2f   : > { %p1294_p8 = scmp.ne.s32.totalorder %s1287_s8, %s1293_s10  ;;  %p1299_p0 = scmp.lt.s32.totalorder %s1297_s28, %s1293_s10 }
  0x31   : > { %p1295_p9 = pnand %p1294_p8, %p1518_p7  ;;  %p1300_p3 = por %p1299_p0, %p1298_p1 }
  0x33   : > { %p1296_p10 = pneg %p1295_p9 }
  0x35   : > { %p1301_p2 = pnand %p1300_p3, %p1296_p10 }
  0x37   : > { %1304 = shalt.err (!%p1301_p2)
}
  0x38   : > { %s1305_s6 = sshra.s32 %s171_s29, 4  ;;  %s1411_s11 = smov [#allocation2]   ;;  %s1306_s6 = int_to_ptr.vmem [resolvable:$true] %s1305_s6 }
  0x39   : > { %s1312_s9 = scalar_lea.vmem %s1306_s6, %s1697_s17  ;;  %s1316_s19 = scalar_lea.vmem %s1411_s11, 448 }
  0x3a   : > { %p1313_p5 = scmp.ne.s32.totalorder %s1306_s6, %s1312_s9  ;;  %p1318_p4 = scmp.lt.s32.totalorder %s1316_s19, %s1312_s9 }
  0x3c   : > { %p1314_p8 = pnand %p1313_p5, %p1518_p7 }
  0x3e   : > { %p1315_p9 = pneg %p1314_p8 }
  0x40   : > { %p1320_p12 = pnand %p1318_p4, %p1315_p9 }
  0x42   : > { %1323 = shalt.err (!%p1320_p12)
}
  0x43   : > { %s1412_s8 = smov 896   ;;  %s1413_s10 = smov 56  }
  0x44   : > { %176 = dma.hbm_to_vmem [thread:$0]  (%p1518_p7), %s1531_s7, %s1525_s30, %s171_s29, %s1515_s20, %s1412_s8, %s1412_s8, %s1413_s10  }
  0x45 PF: > { %182 = sbr.rel (%p1497_p13) target bundleno = 334 (0x14e), region = 32  ;;  %s1558_s17 = sand.u32 (!%p1497_p13), 1, %s1398_s13  }
  0x46   : > { %s1198_s27 = smul.u32 (!%p1497_p13), 224, %s1558_s17  ;;  %s185_s28 = scalar_lea.sflag (!%p1497_p13), [#allocation3], %s1558_s17 }
  0x48   : > { %s1562_s4 = scalar_lea.vmem (!%p1497_p13), [#allocation2], %s1198_s27 }
  0x4a   : > { %1381 = dma.done.wait (%p1482_p6), %s185_s28, 3584  }
  0x4b   : > { %1383 = vsyncadd (%p1482_p6), %s185_s28, 4294963712  ;;  %p1685_p4 = scmp.eq.s32.totalorder %s1458_s16, 0 }
  0x4d   : > { %1385 = dma.done.wait (%p1685_p4), [#allocation6], 6272   ;;  %p1686_p12 = pmov %p1685_p4 }
  0x4e   : > { %v1145_v0 = vld [vmem:[#allocation5 + $0x38] sm:$0xff]  ;;  %v1144_v4 = vld [vmem:[#allocation5 + $0x30] sm:$0xff]  ;;  %v1143_v8 = vld [vmem:[#allocation5 + $0x28] sm:$0xff]  ;;  %vm667_vm0 = vcmask 130048   ;;  %s930_s20 = sshll.u32 %s1558_s17, 5  ;;  %s812_s29 = scalar_lea.sflag [#allocation4], %s1558_s17 }
  0x4f   : > { %1387 = vsyncadd (%p1686_p12), [#allocation6], 4294961024  ;;  %v1153_v1 = vld [vmem:[#allocation5 + $0x78] sm:$0xff]  ;;  %674 = vmatpush.bf16.msra.mxu0 %v1145_v0  ;;  %v1152_v5 = vld [vmem:[#allocation5 + $0x70] sm:$0xff]  ;;  %s1604_s22 = scalar_lea.vmem [#allocation7], %s930_s20  ;;  %s1130_s30 = sshll.u32 (%p1489_p11), %s1458_s16, 2 }
  0x50   : > { %v1161_v2 = vld [vmem:[#allocation5 + $0xb8] sm:$0xff]  ;;  %693 = vmatpush.bf16.msra.mxu1 %v1153_v1  ;;  %v1160_v6 = vld [vmem:[#allocation5 + $0xb0] sm:$0xff]  ;;  %v1151_v9 = vld [vmem:[#allocation5 + $0x68] sm:$0xff]  ;;  %s820_s7 = ssub.s32 (%p1489_p11), 7, %s1130_s30 }
  0x51   : > { %v1169_v3 = vld [vmem:[#allocation5 + $0xf8] sm:$0xff]  ;;  %712 = vmatpush.bf16.msra.mxu2 %v1161_v2  ;;  %v1168_v7 = vld [vmem:[#allocation5 + $0xf0] sm:$0xff]  ;;  %v1159_v10 = vld [vmem:[#allocation5 + $0xa8] sm:$0xff]  ;;  %p821_p6 = scmp.lt.s32.totalorder (%p1489_p11), %s820_s7, 4 }
  0x52   : > { %731 = vmatpush.bf16.msra.mxu3 %v1169_v3  ;;  %v1167_v11 = vld [vmem:[#allocation5 + $0xe8] sm:$0xff]  ;;  %v1142_v12 = vld [vmem:[#allocation5 + $0x20] sm:$0xff]  ;;  %v1141_v16 = vld [vmem:[#allocation5 + $0x18] sm:$0xff] }
  0x53   : > { %675 = vmatpush.bf16.msra.mxu0 %v1144_v4  ;;  %v1150_v13 = vld [vmem:[#allocation5 + $0x60] sm:$0xff]  ;;  %v1149_v17 = vld [vmem:[#allocation5 + $0x58] sm:$0xff]  ;;  %v1140_v20 = vld [vmem:[#allocation5 + $0x10] sm:$0xff] }
  0x54   : > { %694 = vmatpush.bf16.msra.mxu1 %v1152_v5  ;;  %v1158_v14 = vld [vmem:[#allocation5 + $0xa0] sm:$0xff]  ;;  %v1157_v18 = vld [vmem:[#allocation5 + $0x98] sm:$0xff]  ;;  %v1148_v21 = vld [vmem:[#allocation5 + $0x50] sm:$0xff] }
  0x55   : > { %713 = vmatpush.bf16.msra.mxu2 %v1160_v6  ;;  %v1166_v15 = vld [vmem:[#allocation5 + $0xe0] sm:$0xff]  ;;  %v1165_v19 = vld [vmem:[#allocation5 + $0xd8] sm:$0xff]  ;;  %v1156_v22 = vld [vmem:[#allocation5 + $0x90] sm:$0xff] }
  0x56   : > { %732 = vmatpush.bf16.msra.mxu3 %v1168_v7  ;;  %v1164_v23 = vld [vmem:[#allocation5 + $0xd0] sm:$0xff]  ;;  %v1139_v24 = vld [vmem:[#allocation5 + $0x8] sm:$0xff]  ;;  %v1138_v28 = vld [vmem:[#allocation5] sm:$0xff] }
  0x57   : > { %676 = vmatpush.bf16.msra.mxu0 %v1143_v8  ;;  %v1147_v25 = vld [vmem:[#allocation5 + $0x48] sm:$0xff]  ;;  %v1146_v29 = vld [vmem:[#allocation5 + $0x40] sm:$0xff]  ;;  %v236_v33 = vld [vmem:[%s1562_s4 + $0x38] sm:$0xff] }
  0x58   : > { %695 = vmatpush.bf16.msra.mxu1 %v1151_v9  ;;  %v1155_v26 = vld [vmem:[#allocation5 + $0x88] sm:$0xff]  ;;  %v1154_v30 = vld [vmem:[#allocation5 + $0x80] sm:$0xff]  ;;  %v231_v36 = vld [vmem:[%s1562_s4 + $0x10] sm:$0xff] }
  0x59   : > { %714 = vmatpush.bf16.msra.mxu2 %v1159_v10  ;;  %v1163_v27 = vld [vmem:[#allocation5 + $0xc8] sm:$0xff]  ;;  %v1162_v31 = vld [vmem:[#allocation5 + $0xc0] sm:$0xff]  ;;  %v232_v38 = vld [vmem:[%s1562_s4 + $0x18] sm:$0xff] }
  0x5a   : > { %733 = vmatpush.bf16.msra.mxu3 %v1167_v11  ;;  %v229_v32 = vld [vmem:[%s1562_s4] sm:$0xff]  ;;  %v230_v34 = vld [vmem:[%s1562_s4 + $0x8] sm:$0xff]  ;;  %v239_v39 = vld [vmem:[%s1562_s4 + $0x50] sm:$0xff] }
  0x5b   : > { %677 = vmatpush.bf16.msra.mxu0 %v1142_v12  ;;  %v237_v35 = vld [vmem:[%s1562_s4 + $0x40] sm:$0xff]  ;;  %v238_v37 = vld [vmem:[%s1562_s4 + $0x48] sm:$0xff]  ;;  %v1177_v41 = vld [vmem:[#allocation5 + $0x138] sm:$0xff]  ;;  %v257_v42 = vpack.c.bf16 %v236_v33, %v229_v32  ;;  %v260_v45 = vpack.c.bf16 %v239_v39, %v232_v38 }
  0x5c   : > { %696 = vmatpush.bf16.msra.mxu1 %v1150_v13  ;;  %v1186_v40 = vld [vmem:[#allocation5 + $0x180] sm:$0xff]  ;;  %v258_v43 = vpack.c.bf16 %v237_v35, %v230_v34  ;;  %v259_v44 = vpack.c.bf16 %v238_v37, %v231_v36  ;;  %v1185_v46 = vld [vmem:[#allocation5 + $0x178] sm:$0xff]  ;;  %v1176_v47 = vld [vmem:[#allocation5 + $0x130] sm:$0xff] }
  0x5d   : > { %715 = vmatpush.bf16.msra.mxu2 %v1158_v14  ;;  %v1184_v48 = vld [vmem:[#allocation5 + $0x170] sm:$0xff]  ;;  %v1175_v49 = vld [vmem:[#allocation5 + $0x128] sm:$0xff]  ;;  %v1174_v51 = vld [vmem:[#allocation5 + $0x120] sm:$0xff] }
  0x5e   : > { %734 = vmatpush.bf16.msra.mxu3 %v1166_v15  ;;  %v1183_v50 = vld [vmem:[#allocation5 + $0x168] sm:$0xff]  ;;  %v1182_v52 = vld [vmem:[#allocation5 + $0x160] sm:$0xff]  ;;  %v243_v53 = vld [vmem:[%s1562_s4 + $0x70] sm:$0xff] }
  0x5f   : > { %678 = vmatpush.bf16.msra.mxu0 %v1141_v16  ;;  %v250_v54 = vld [vmem:[%s1562_s4 + $0xa8] sm:$0xff]  ;;  %v244_v55 = vld [vmem:[%s1562_s4 + $0x78] sm:$0xff]  ;;  %v251_v56 = vld [vmem:[%s1562_s4 + $0xb0] sm:$0xff] }
  0x60   : > { %697 = vmatpush.bf16.msra.mxu1 %v1149_v17  ;;  %v245_v57 = vld [vmem:[%s1562_s4 + $0x80] sm:$0xff]  ;;  %v252_v58 = vld [vmem:[%s1562_s4 + $0xb8] sm:$0xff]  ;;  %v246_v59 = vld [vmem:[%s1562_s4 + $0x88] sm:$0xff]  ;;  %v264_v62 = vpack.c.bf16 %v250_v54, %v243_v53  ;;  %v265_v63 = vpack.c.bf16 %v251_v56, %v244_v55 }
  0x61   : > { %716 = vmatpush.bf16.msra.mxu2 %v1157_v18  ;;  %v253_v60 = vld [vmem:[%s1562_s4 + $0xc0] sm:$0xff]  ;;  %v1173_v61 = vld [vmem:[#allocation5 + $0x118] sm:$0xff]  ;;  %v266_v0 = vpack.c.bf16 %v252_v58, %v245_v57  ;;  %v1172_v3 = vld [vmem:[#allocation5 + $0x110] sm:$0xff] }
  0x62   : > { %735 = vmatpush.bf16.msra.mxu3 %v1165_v19  ;;  %v267_v1 = vpack.c.bf16 %v253_v60, %v246_v59  ;;  %v1181_v2 = vld [vmem:[#allocation5 + $0x158] sm:$0xff]  ;;  %v1180_v4 = vld [vmem:[#allocation5 + $0x150] sm:$0xff]  ;;  %v1171_v5 = vld [vmem:[#allocation5 + $0x108] sm:$0xff] }
  0x63   : > { %679 = vmatpush.bf16.msra.mxu0 %v1140_v20  ;;  %v1179_v6 = vld [vmem:[#allocation5 + $0x148] sm:$0xff]  ;;  %v1170_v7 = vld [vmem:[#allocation5 + $0x100] sm:$0xff]  ;;  %v240_v10 = vld [vmem:[%s1562_s4 + $0x58] sm:$0xff] }
  0x64   : > { %698 = vmatpush.bf16.msra.mxu1 %v1148_v21  ;;  %v1178_v8 = vld [vmem:[#allocation5 + $0x140] sm:$0xff]  ;;  %v247_v11 = vld [vmem:[%s1562_s4 + $0x90] sm:$0xff]  ;;  %v254_v12 = vld [vmem:[%s1562_s4 + $0xc8] sm:$0xff] }
  0x65   : > { %717 = vmatpush.bf16.msra.mxu2 %v1156_v22  ;;  %v233_v9 = vld [vmem:[%s1562_s4 + $0x20] sm:$0xff]  ;;  %v234_v13 = vld [vmem:[%s1562_s4 + $0x28] sm:$0xff]  ;;  %v235_v15 = vld [vmem:[%s1562_s4 + $0x30] sm:$0xff]  ;;  %v268_v18 = vpack.c.bf16 %v254_v12, %v247_v11 }
  0x66   : > { %736 = vmatpush.bf16.msra.mxu3 %v1164_v23  ;;  %v241_v14 = vld [vmem:[%s1562_s4 + $0x60] sm:$0xff]  ;;  %v242_v16 = vld [vmem:[%s1562_s4 + $0x68] sm:$0xff]  ;;  %v261_v17 = vpack.c.bf16 %v240_v10, %v233_v9  ;;  %v248_v21 = vld [vmem:[%s1562_s4 + $0x98] sm:$0xff] }
  0x67   : > { %680 = vmatpush.bf16.msra.mxu0 %v1139_v24  ;;  %v262_v19 = vpack.c.bf16 %v241_v14, %v234_v13  ;;  %v263_v20 = vpack.c.bf16 %v242_v16, %v235_v15  ;;  %v255_v22 = vld [vmem:[%s1562_s4 + $0xd0] sm:$0xff]  ;;  %v249_v23 = vld [vmem:[%s1562_s4 + $0xa0] sm:$0xff]  ;;  %v256_v24 = vld [vmem:[%s1562_s4 + $0xd8] sm:$0xff] }
  0x68   : > { %699 = vmatpush.bf16.msra.mxu1 %v1147_v25  ;;  %v269_v25 = vpack.c.bf16 %v255_v22, %v248_v21  ;;  %v1255_v36 = vld [vmem:[%s1675_s2] ss:$0 sm:$0xff] }
  0x69   : > { %718 = vmatpush.bf16.msra.mxu2 %v1155_v26  ;;  %v270_v26 = vpack.c.bf16 %v256_v24, %v249_v23 }
  0x6a   : > { %737 = vmatpush.bf16.msra.mxu3 %v1163_v27 }
  0x6b   : > { %681 = vmatpush.bf16.msra.mxu0 %v1138_v28 }
  0x6c   : > { %700 = vmatpush.bf16.msra.mxu1 %v1146_v29 }
  0x6d   : > { %719 = vmatpush.bf16.msra.mxu2 %v1154_v30 }
  0x6e   : > { %738 = vmatpush.bf16.msra.mxu3 %v1162_v31  ;;  %682 = vmatmul.bf16.vlgmr.msra.gmra.mxu0 %v257_v42 }
  0x6f   : > { %750 = vmatpush.bf16.msrb.mxu0 %v1177_v41  ;;  %701 = vmatmul.bf16.vlgmr.msra.gmra.mxu1 %v258_v43 }
  0x70   : > { %720 = vmatmul.bf16.vlgmr.msra.gmra.mxu2 %v259_v44  ;;  %769 = vmatpush.bf16.msrb.mxu1 %v1185_v46 }
  0x71   : > { %795 = vmatpush.bf16.msrb.mxu2 %v1186_v40  ;;  %739 = vmatmul.bf16.vlgmr.msra.gmra.mxu3 %v260_v45 }
  0x72   : > { %1188 = vmatpush.bf16.msrb.mxu3 %v1177_v41 }
  0x73   : > { %751 = vmatpush.bf16.msrb.mxu0 %v1176_v47 }
  0x74   : > { %770 = vmatpush.bf16.msrb.mxu1 %v1184_v48 }
  0x76   : > { %1189 = vmatpush.bf16.msrb.mxu3 %v1176_v47 }
  0x77   : > { %752 = vmatpush.bf16.msrb.mxu0 %v1175_v49 }
  0x78   : > { %771 = vmatpush.bf16.msrb.mxu1 %v1183_v50 }
  0x7a   : > { %1190 = vmatpush.bf16.msrb.mxu3 %v1175_v49 }
  0x7b   : > { %753 = vmatpush.bf16.msrb.mxu0 %v1174_v51 }
  0x7c   : > { %772 = vmatpush.bf16.msrb.mxu1 %v1182_v52 }
  0x7e   : > { %1191 = vmatpush.bf16.msrb.mxu3 %v1174_v51  ;;  %687 = vmatmul.bf16.gmra.mxu0 %v264_v62 }
  0x7f   : > { %754 = vmatpush.bf16.msrb.mxu0 %v1173_v61  ;;  %706 = vmatmul.bf16.gmra.mxu1 %v265_v63 }
  0x80   : > { %725 = vmatmul.bf16.gmra.mxu2 %v266_v0  ;;  %773 = vmatpush.bf16.msrb.mxu1 %v1181_v2 }
  0x81   : > { %744 = vmatmul.bf16.gmra.mxu3 %v267_v1 }
  0x82   : > { %1192 = vmatpush.bf16.msrb.mxu3 %v1173_v61 }
  0x83   : > { %755 = vmatpush.bf16.msrb.mxu0 %v1172_v3 }
  0x84   : > { %774 = vmatpush.bf16.msrb.mxu1 %v1180_v4 }
  0x86   : > { %1193 = vmatpush.bf16.msrb.mxu3 %v1172_v3 }
  0x87   : > { %756 = vmatpush.bf16.msrb.mxu0 %v1171_v5 }
  0x88   : > { %775 = vmatpush.bf16.msrb.mxu1 %v1179_v6 }
  0x8a   : > { %1194 = vmatpush.bf16.msrb.mxu3 %v1171_v5 }
  0x8b   : > { %757 = vmatpush.bf16.msrb.mxu0 %v1170_v7 }
  0x8c   : > { %776 = vmatpush.bf16.msrb.mxu1 %v1178_v8 }
  0x8e   : > { %1195 = vmatpush.bf16.msrb.mxu3 %v1170_v7  ;;  %758 = vmatmul.bf16.vlgmr.msrb.gmra.mxu0 %v261_v17 }
  0x8f   : > { %777 = vmatmul.bf16.vlgmr.msrb.gmra.mxu1 %v262_v19 }
  0x90   : > { %1127 = vmatmul.msk.bf16.vlgmr.msrb.gmra.mxu2 %vm667_vm0, %v263_v20 }
  0x91   : > { %763 = vmatmul.bf16.vlgmr.msrb.gmra.mxu3 %v268_v18 }
  0x9f   : > { %782 = vmatmul.bf16.gmra.mxu1 %v269_v25 }
  0xa0   : > { %1128 = vmatmul.msk.bf16.gmra.mxu2 %vm667_vm0, %v270_v26 }
  0xeb   : > { %v683_v27 = vpop.f32.mrf.mxu0 }
  0xec   : > { %v702_v28 = vpop.f32.mrf.mxu1  ;;  %v684_v38 = vadd.f32 %v1255_v36, %v683_v27 }
  0xee   : > { %v703_v42 = vadd.f32 %v702_v28, %v684_v38 }
  0xf3   : > { %v721_v29 = vpop.f32.mrf.mxu2  ;;  %v685_v31 = vpop.f32.mrf.mxu0 }
  0xf4   : > { %v740_v30 = vpop.f32.mrf.mxu3  ;;  %v704_v32 = vpop.f32.mrf.mxu1  ;;  %v722_v44 = vadd.f32 %v721_v29, %v703_v42  ;;  %v686_v45 = vadd.f32 %v1255_v36, %v685_v31 }
  0xf6   : > { %v741_v48 = vadd.f32 %v740_v30, %v722_v44  ;;  %v705_v50 = vadd.f32 %v704_v32, %v686_v45 }
  0xfb   : > { %v723_v33 = vpop.f32.mrf.mxu2  ;;  %v688_v34 = vpop.f32.mrf.mxu0 }
  0xfc   : > { %v707_v35 = vpop.f32.mrf.mxu1  ;;  %v742_v37 = vpop.f32.mrf.mxu3  ;;  %v724_v52 = vadd.f32 %v723_v33, %v705_v50  ;;  %v689_v54 = vadd.f32 %v1255_v36, %v688_v34 }
  0xfe   : > { %v743_v58 = vadd.f32 %v742_v37, %v724_v52  ;;  %v708_v61 = vadd.f32 %v707_v35, %v689_v54 }
 0x103   : > { %v726_v39 = vpop.f32.mrf.mxu2  ;;  %v690_v40 = vpop.f32.mrf.mxu0 }
 0x104   : > { %v709_v41 = vpop.f32.mrf.mxu1  ;;  %v745_v43 = vpop.f32.mrf.mxu3  ;;  %v727_v63 = vadd.f32 %v726_v39, %v708_v61  ;;  %v691_v3 = vadd.f32 %v1255_v36, %v690_v40 }
 0x106   : > { %v746_v6 = vadd.f32 %v745_v43, %v727_v63  ;;  %v710_v7 = vadd.f32 %v709_v41, %v691_v3 }
 0x10b   : > { %v728_v46 = vpop.f32.mrf.mxu2  ;;  %v759_v47 = vpop.f32.mrf.mxu0 }
 0x10c   : > { %v778_v49 = vpop.f32.mrf.mxu1  ;;  %v760_v51 = vadd.f32 %v759_v47, %v741_v48  ;;  %v747_v53 = vpop.f32.mrf.mxu3  ;;  %v729_v9 = vadd.f32 %v728_v46, %v710_v7 }
 0x10e   : > { %v779_v55 = vadd.f32 %v778_v49, %v760_v51  ;;  %v748_v14 = vadd.f32 %v747_v53, %v729_v9 }
 0x113   : > { %v797_v56 = vpop.f32.mrf.mxu2  ;;  %v761_v57 = vpop.f32.mrf.mxu0 }
 0x114   : > { %v798_v59 = vadd.f32 %v797_v56, %v779_v55  ;;  %v780_v60 = vpop.f32.mrf.mxu1  ;;  %v762_v62 = vadd.f32 %v761_v57, %v743_v58  ;;  %v764_v1 = vpop.f32.mrf.mxu3 }
 0x115   : > { %v765_v8 = vadd.f32 %v764_v1, %v746_v6 }
 0x116   : > { %807 = vst [vmem:[%s1604_s22] sm:$0xff] %v798_v59  ;;  %v781_v0 = vadd.f32 %v780_v60, %v762_v62 }
 0x11b   : > { %v799_v2 = vpop.f32.mrf.mxu2 }
 0x11c   : > { %v800_v4 = vadd.f32 %v799_v2, %v781_v0  ;;  %v783_v5 = vpop.f32.mrf.mxu1  ;;  %v766_v13 = vpop.f32.mrf.mxu3 }
 0x11d   : > { %v784_v10 = vadd.f32 %v783_v5, %v765_v8  ;;  %v767_v16 = vadd.f32 %v766_v13, %v748_v14 }
 0x11e   : > { %808 = vst [vmem:[%s1604_s22 + $0x8] sm:$0xff] %v800_v4 }
 0x123   : > { %v802_v11 = vpop.f32.mrf.mxu2 }
 0x124   : > { %v803_v12 = vadd.f32 %v802_v11, %v784_v10  ;;  %v785_v15 = vpop.f32.mrf.mxu1 }
 0x125   : > { %v786_v17 = vadd.f32 %v785_v15, %v767_v16 }
 0x126   : > { %809 = vst [vmem:[%s1604_s22 + $0x10] sm:$0xff] %v803_v12 }
 0x12a   : > { %818 = sbr.rel (!%p1489_p11) target bundleno = 334 (0x14e), region = 44 }
 0x12b   : > { %v804_v18 = vpop.f32.mrf.mxu2 }
 0x12c   : > { %v805_v19 = vadd.f32 %v804_v18, %v786_v17 }
 0x12e   : > { %810 = vst [vmem:[%s1604_s22 + $0x18] sm:$0xff] %v805_v19 }
 0x12f   : > { %s1699_s7 = smov (!%p821_p6, %s820_s7), 4 }
 0x130   : > { %s1131_s5 = sshll.u32 %s1699_s7, 3 }
 0x131   : > { %s824_s6 = ssub.s32 32, %s1131_s5 }
 0x132   : > { %s825_s9 = sshll.u32 %s824_s6, 4 }
 0x133   : > { %826 = vsyncadd %s812_s29, %s825_s9  ;;  %p1619_p13 = scmp.ne.s32.totalorder %s1131_s5, 0  ;;  %s1187_s11 = sshll.u32 %s1458_s16, 5 }
 0x134   : > { %s829_s10 = scalar_lea.hbm %s1676_s3, %s1187_s11  ;;  %s831_s27 = sshll.u32 %s1604_s22, 4  ;;  %s1628_s27 = int_to_ptr.vmem [resolvable:$true] %s831_s27 }
 0x135   : > { %s833_s28 = sshll.u32 %s829_s10, 4  ;;  %s1135_s4 = sshll.u32 %s1699_s7, 7  ;;  %s1630_s28 = int_to_ptr.hbm [resolvable:$true] %s833_s28 }
 0x136   : > { %s1325_s23 = sshra.s32 %s1628_s27, 4  ;;  %s1327_s26 = sshrl.u32 %s1135_s4, 4  ;;  %s1326_s23 = int_to_ptr.vmem [resolvable:$true] %s1325_s23 }
 0x137   : > { %s1332_s20 = scalar_lea.vmem %s1326_s23, %s1327_s26  ;;  %s1414_s16 = smov [#allocation7]  }
 0x138   : > { %p1333_p11 = scmp.ne.s32.totalorder %s1326_s23, %s1332_s20  ;;  %s1336_s30 = scalar_lea.vmem %s1414_s16, 64 }
 0x139   : > { %p1338_p10 = scmp.lt.s32.totalorder %s1336_s30, %s1332_s20 }
 0x13a   : > { %p1334_p2 = pnand %p1333_p11, %p1619_p13 }
 0x13c   : > { %p1335_p7 = pneg %p1334_p2 }
 0x13e   : > { %p1340_p1 = pnand %p1338_p10, %p1335_p7 }
 0x140   : > { %1343 = shalt.err (!%p1340_p1)
}
 0x141   : > { %s1344_s22 = sshra.s32 %s1630_s28, 4  ;;  %s1355_s11 = scalar_lea.hbm %s1676_s3, 56  ;;  %s1345_s22 = int_to_ptr.hbm [resolvable:$true] %s1344_s22 }
 0x142   : > { %s1351_s5 = scalar_lea.hbm %s1345_s22, %s1327_s26  ;;  %p1356_p8 = scmp.lt.s32.totalorder %s1345_s22, %s1676_s3 }
 0x143   : > { %p1352_p0 = scmp.ne.s32.totalorder %s1345_s22, %s1351_s5  ;;  %p1357_p9 = scmp.lt.s32.totalorder %s1355_s11, %s1351_s5 }
 0x145   : > { %p1353_p3 = pnand %p1352_p0, %p1619_p13  ;;  %p1358_p4 = por %p1357_p9, %p1356_p8 }
 0x147   : > { %p1354_p5 = pneg %p1353_p3 }
 0x149   : > { %p1359_p12 = pnand %p1358_p4, %p1354_p5 }
 0x14b   : > { %1362 = shalt.err (!%p1359_p12)
}
 0x14c   : > { %s1415_s10 = smov 128   ;;  %s1416_s23 = smov 8  }
 0x14d   : > { %839 = dma.vmem_to_hbm [thread:$0]  (%p1619_p13), %s1628_s27, %s1135_s4, %s1630_s28, %s812_s29, %s1415_s10, %s1415_s10, %s1416_s23  }
 0x14e PF: > { %s848_s26 = sand.u32 1, %s1394_s12   ;;  %p1688_p6 = scmp.ne.s32.totalorder %s1682_s25, 0 }
 0x14f   : > { %p1689_p11 = scmp.ge.s32.totalorder %s1406_s15, 2  ;;  %s849_s20 = scalar_lea.sflag [#allocation4], %s848_s26 }
 0x151   : > { %p1210_p2 = pnand %p1689_p11, %p1688_p6 }
 0x153   : > { %p1211_p7 = pneg %p1210_p2 }
 0x155   : > { %1389 = dma.done.wait (%p1211_p7), %s849_s20, 512  }
 0x156   : > { %1391 = vsyncadd (%p1211_p7), %s849_s20, 4294966784  ;;  %p17_p10 = scmp.ge.s32.totalorder %s1462_s18, 4   ;;  %s1690_s12 = smov %s1398_s13 }
 0x157   : > { %s1691_s13 = smov %s1402_s14  ;;  %s1692_s14 = smov %s1474_s21 }
 0x158   : > { %s1693_s15 = smov %s1462_s18  ;;  %19 = sbr.rel (!%p17_p10) target bundleno = 6 (0x6), region = 81 }
 0x15d   :  { %855 = vsyncpa [#allocation3], 1 }
 0x15e   :  { %857 = vsyncpa [#allocation3 + $0x1], 1 }
 0x15f   :  { %858 = vsyncpa [#allocation6], 1 }
 0x160   :  { %859 = vsyncpa [#allocation4], 1 }
 0x161   :  { %861 = vsyncpa [#allocation4 + $0x1], 1 }

</bundles_post_ra>
